<compile_context>
chip_gen: v5e
topology: v5e:2x2
jax: 0.10.0
libtpu: 0.0.40
codegen_flags: <defaults>
</compile_context>

<pallas_src>
import functools

import jax
import jax.numpy as jnp
from jax.experimental import pallas as pl
from jax.experimental.pallas import tpu as pltpu

OBS_DIM = 5
HIDDEN = 128
N_ACTIONS = 6   # len(Action.ALL_ACTIONS); synthetic value for this kernel

OBS_PAD = 8     # contraction dim padded to a sublane multiple (col 5 = bias ones)
OUT_PAD = 128   # output dim padded to a full lane width


def _policy_kernel(x_ref, w1_ref, w2_ref, b2_ref, out_ref):
    # Layer 1: bf16 MXU matmul with f32 accumulation.  b1 is folded into
    # w1_ref row OBS_DIM (x carries a 1.0 in that column), so this already
    # includes the bias.  ReLU runs in f32 on the VPU.
    h = jnp.dot(x_ref[...], w1_ref[...], preferred_element_type=jnp.float32)
    h = jnp.maximum(h, 0.0)
    # Layer 2: bf16 MXU matmul into the lane-dense (padded to 128) output,
    # f32 bias add, then cast once to the bf16 output slab.
    logits = jnp.dot(h.astype(jnp.bfloat16), w2_ref[...],
                     preferred_element_type=jnp.float32)
    out_ref[...] = (logits + b2_ref[...]).astype(out_ref.dtype)


def _round_up(n, m):
    return ((n + m - 1) // m) * m


def _tiling(batch, block_b):
    """Pick (tile_rows, padded_batch).

    Balances tiles so padding stays within 8 rows of `batch`, caps the tile at
    roughly `block_b`, and (when there are enough rows) uses >= 2 grid steps so
    both v7x TensorCores are used via the "parallel" grid axis.
    """
    b8 = _round_up(batch, 8)
    steps = -(-b8 // block_b)          # ceil
    if b8 >= 16:
        steps = max(steps, 2)
    tb = _round_up(-(-b8 // steps), 8)
    steps = -(-b8 // tb)
    return tb, tb * steps


def prepare_params(w1, b1, w2, b2):
    """One-time prep of logical params into TPU-friendly bf16 tiles.

    Logical layout (transpose of PyTorch's [out, in]):
      w1: (OBS_DIM, HIDDEN), b1: (1, HIDDEN)
      w2: (HIDDEN, N_ACTIONS), b2: (1, N_ACTIONS)

    Returns:
      w1p: (OBS_PAD, HIDDEN) bf16, with row OBS_DIM = b1 (folded bias)
      w2p: (HIDDEN, OUT_PAD) bf16, zero-padded beyond N_ACTIONS
      b2p: (1, OUT_PAD)      f32,  zero-padded beyond N_ACTIONS
    """
    w1p = jnp.zeros((OBS_PAD, HIDDEN), jnp.float32)
    w1p = w1p.at[:OBS_DIM, :].set(w1)
    w1p = w1p.at[OBS_DIM, :].set(jnp.reshape(b1, (HIDDEN,)))
    w2p = jnp.zeros((HIDDEN, OUT_PAD), jnp.float32).at[:, :N_ACTIONS].set(w2)
    b2p = jnp.zeros((1, OUT_PAD), jnp.float32).at[:, :N_ACTIONS].set(b2)
    return w1p.astype(jnp.bfloat16), w2p.astype(jnp.bfloat16), b2p


@functools.partial(jax.jit, static_argnames=("block_b",))
def policy_forward(x, w1p, w2p, b2p, block_b=1024):
    """x: [B, OBS_DIM] f32 -> logits [B, N_ACTIONS] f32."""
    B = x.shape[0]
    tb, Bp = _tiling(B, block_b)

    # Pad batch rows / obs dim in bf16; column OBS_DIM carries 1.0 so the
    # folded b1 row of w1p acts as the bias.  (Padded rows get no bias and are
    # sliced off below, so that is inert.)
    # TODO(synk): if the rollout pipeline can emit (B, 8) bf16 observations
    # with the ones column pre-filled, this wrapper pad disappears entirely.
    xp = jnp.zeros((Bp, OBS_PAD), jnp.bfloat16)
    xp = xp.at[:B, :OBS_DIM].set(x.astype(jnp.bfloat16))
    xp = xp.at[:B, OBS_DIM].set(1.0)

    out = pl.pallas_call(
        _policy_kernel,
        out_shape=jax.ShapeDtypeStruct((Bp, OUT_PAD), jnp.bfloat16),
        grid=(Bp // tb,),
        in_specs=[
            pl.BlockSpec((tb, OBS_PAD), lambda i: (i, 0)),        # x tile
            pl.BlockSpec((OBS_PAD, HIDDEN), lambda i: (0, 0)),    # w1 (resident)
            pl.BlockSpec((HIDDEN, OUT_PAD), lambda i: (0, 0)),    # w2 (resident)
            pl.BlockSpec((1, OUT_PAD), lambda i: (0, 0)),         # b2 (resident)
        ],
        out_specs=pl.BlockSpec((tb, OUT_PAD), lambda i: (i, 0)),
        compiler_params=pltpu.CompilerParams(
            dimension_semantics=("parallel",),
        ),
    )(xp, w1p, w2p, b2p)

    # Module semantics: f32 logits of shape [B, N_ACTIONS].
    return out[:B, :N_ACTIONS].astype(jnp.float32)


def init_params(key):
    """Deterministic parameter init (PyTorch-Linear-style uniform fan-in)."""
    k1, k2, k3, k4 = jax.random.split(key, 4)
    bound1 = 1.0 / (OBS_DIM ** 0.5)
    bound2 = 1.0 / (HIDDEN ** 0.5)
    w1 = jax.random.uniform(k1, (OBS_DIM, HIDDEN), jnp.float32, -bound1, bound1)
    b1 = jax.random.uniform(k2, (1, HIDDEN), jnp.float32, -bound1, bound1)
    w2 = jax.random.uniform(k3, (HIDDEN, N_ACTIONS), jnp.float32, -bound2, bound2)
    b2 = jax.random.uniform(k4, (1, N_ACTIONS), jnp.float32, -bound2, bound2)
    return w1, b1, w2, b2


def _reference_bf16_path(x, w1p, w2p, b2p):
    """Same numerics as the kernel (bf16 operands, f32 acc, bf16 store)."""
    B = x.shape[0]
    xa = jnp.concatenate(
        [x.astype(jnp.bfloat16), jnp.ones((B, 1), jnp.bfloat16)], axis=1)
    h = jnp.dot(xa, w1p[:OBS_DIM + 1, :], preferred_element_type=jnp.float32)
    h = jnp.maximum(h, 0.0)
    logits = jnp.dot(h.astype(jnp.bfloat16), w2p,
                     preferred_element_type=jnp.float32) + b2p
    return logits[:, :N_ACTIONS].astype(jnp.bfloat16).astype(jnp.float32)


if __name__ == "__main__":
    key = jax.random.PRNGKey(0)
    key_x1, key_x2, key_p = jax.random.split(key, 3)

    w1, b1, w2, b2 = init_params(key_p)
    w1p, w2p, b2p = prepare_params(w1, b1, w2, b2)

    # Small demo batches; real use should batch rollout steps (B >= 1024).
    # batch=8  -> single grid step; batch=40 -> 2 grid steps + padded rows.
    for batch, kx in ((8, key_x1), (40, key_x2)):
        x = jax.random.normal(kx, (batch, OBS_DIM), jnp.float32)
        logits = policy_forward(x, w1p, w2p, b2p)
        jax.block_until_ready(logits)
        assert logits.shape == (batch, N_ACTIONS)

        # Reference 1: identical bf16/f32 math path -> tight check.
        ref_bf = _reference_bf16_path(x, w1p, w2p, b2p)
        assert jnp.allclose(logits, ref_bf, atol=5e-3, rtol=5e-3)

        # Reference 2: pure f32 forward (module semantics) -> loose check for
        # the bf16 MXU operands and bf16 output store.
        ref_f32 = jnp.maximum(x @ w1 + b1, 0.0) @ w2 + b2
        assert jnp.allclose(logits, ref_f32, atol=3e-2, rtol=3e-2)

    print("KERNEL_OK")
</pallas_src>

<mosaic_0001>
module attributes {stable_mosaic.version = 11 : i64} {
  func.func @_policy_kernel(%arg0: i32, %arg1: memref<8x8xbf16, #tpu.memory_space<vmem>>, %arg2: memref<8x128xbf16, #tpu.memory_space<vmem>>, %arg3: memref<128x128xbf16, #tpu.memory_space<vmem>>, %arg4: memref<1x128xf32, #tpu.memory_space<vmem>>, %arg5: memref<8x128xbf16, #tpu.memory_space<vmem>>) attributes {dimension_semantics = [#tpu.dimension_semantics<parallel>], iteration_bounds = array<i64: 1>, scalar_prefetch = 0 : i64, scratch_operands = 0 : i64, tpu.core_type = #tpu.core_type<tc>, window_params = [{transform_indices = @transform_0, window_bounds = array<i64: 8, 8>}, {pipeline_mode = #tpu.pipeline_mode<synchronous>, transform_indices = @transform_1, window_bounds = array<i64: 8, 128>}, {pipeline_mode = #tpu.pipeline_mode<synchronous>, transform_indices = @transform_2, window_bounds = array<i64: 128, 128>}, {pipeline_mode = #tpu.pipeline_mode<synchronous>, transform_indices = @transform_3, window_bounds = array<i64: 1, 128>}, {transform_indices = @transform_4, window_bounds = array<i64: 8, 128>}]} {
    %c0 = arith.constant 0 : index
    %c0_0 = arith.constant 0 : index
    %0 = vector.load %arg1[%c0, %c0_0] : memref<8x8xbf16, #tpu.memory_space<vmem>>, vector<8x8xbf16>
    %c0_1 = arith.constant 0 : index
    %c0_2 = arith.constant 0 : index
    %1 = vector.load %arg2[%c0_1, %c0_2] : memref<8x128xbf16, #tpu.memory_space<vmem>>, vector<8x128xbf16>
    %cst = arith.constant dense<0.000000e+00> : vector<8x128xf32>
    %2 = tpu.matmul %0, %1, %cst {dimension_numbers = #tpu.dot_dimension_numbers<[1], [0], [0], [1], [0, 0, 1, 1], [], []>} : vector<8x8xbf16>, vector<8x128xbf16>, vector<8x128xf32> -> vector<8x128xf32>
    %cst_3 = arith.constant 0.000000e+00 : f32
    %3 = vector.broadcast %cst_3 : f32 to vector<8x128xf32>
    %4 = arith.maximumf %2, %3 : vector<8x128xf32>
    %5 = arith.truncf %4 : vector<8x128xf32> to vector<8x128xbf16>
    %c0_4 = arith.constant 0 : index
    %c0_5 = arith.constant 0 : index
    %6 = vector.load %arg3[%c0_4, %c0_5] : memref<128x128xbf16, #tpu.memory_space<vmem>>, vector<128x128xbf16>
    %cst_6 = arith.constant dense<0.000000e+00> : vector<8x128xf32>
    %7 = tpu.matmul %5, %6, %cst_6 {dimension_numbers = #tpu.dot_dimension_numbers<[1], [0], [0], [1], [0, 0, 1, 1], [], []>} : vector<8x128xbf16>, vector<128x128xbf16>, vector<8x128xf32> -> vector<8x128xf32>
    %c0_7 = arith.constant 0 : index
    %c0_8 = arith.constant 0 : index
    %8 = vector.load %arg4[%c0_7, %c0_8] : memref<1x128xf32, #tpu.memory_space<vmem>>, vector<1x128xf32>
    %9 = vector.broadcast %8 : vector<1x128xf32> to vector<8x128xf32>
    %10 = arith.addf %7, %9 : vector<8x128xf32>
    %11 = arith.truncf %10 : vector<8x128xf32> to vector<8x128xbf16>
    %c0_9 = arith.constant 0 : index
    %c0_10 = arith.constant 0 : index
    %12 = vector.load %arg5[%c0_9, %c0_10] : memref<8x128xbf16, #tpu.memory_space<vmem>>, vector<8x128xbf16>
    tpu.vector_store %arg5[%c0_9, %c0_10], %11 {strides = array<i32>} : memref<8x128xbf16, #tpu.memory_space<vmem>>, vector<8x128xbf16>,
    return
  }
  func.func @transform_0(%arg0: i32) -> (i32, i32) {
    %c0_i32 = arith.constant 0 : i32
    %c0_i32_0 = arith.constant 0 : i32
    return %arg0, %c0_i32 : i32, i32
  }
  func.func @transform_1(%arg0: i32) -> (i32, i32) {
    %c0_i32 = arith.constant 0 : i32
    %c0_i32_0 = arith.constant 0 : i32
    %c0_i32_1 = arith.constant 0 : i32
    return %c0_i32, %c0_i32_0 : i32, i32
  }
  func.func @transform_2(%arg0: i32) -> (i32, i32) {
    %c0_i32 = arith.constant 0 : i32
    %c0_i32_0 = arith.constant 0 : i32
    %c0_i32_1 = arith.constant 0 : i32
    return %c0_i32, %c0_i32_0 : i32, i32
  }
  func.func @transform_3(%arg0: i32) -> (i32, i32) {
    %c0_i32 = arith.constant 0 : i32
    %c0_i32_0 = arith.constant 0 : i32
    %c0_i32_1 = arith.constant 0 : i32
    return %c0_i32, %c0_i32_0 : i32, i32
  }
  func.func @transform_4(%arg0: i32) -> (i32, i32) {
    %c0_i32 = arith.constant 0 : i32
    %c0_i32_0 = arith.constant 0 : i32
    return %arg0, %c0_i32 : i32, i32
  }
}

</mosaic_0001>

<bundles_post_ra>
// kernel: policy_forward.1
= control target key start
LH: loop header
LB: loop body
LE: loop exit
PB: predicated region body
PF: predicated region fallthrough
CT: control target
= control target key end

     0   :  { %9 = vsyncpa [#allocation3], 0  ;;  %s218_s18 = smov [#allocation2]   ;;  %s219_s20 = smov 64   ;;  %s261_s0 = inlined_call_operand.vmem [shape: bf16[8,8], index: 0, kind: input, shape index: {}]   ;;  %s262_s1 = inlined_call_operand.vmem [shape: bf16[8,128], index: 1, kind: input, shape index: {}]   ;;  %s263_s2 = inlined_call_operand.hbm [shape: bf16[128,128], index: 2, kind: input, shape index: {}]   ;;  %s264_s3 = inlined_call_operand.vmem [shape: f32[1,128], index: 3, kind: input, shape index: {}]   ;;  %s265_s4 = inlined_call_operand.vmem [shape: bf16[8,128], index: 4, kind: output, shape index: {}]  }
   0x1   :  { %s18_s17 = sshll.u32 %s263_s2, 4  ;;  %s20_s19 = sshll.u32 %s218_s18, 4  ;;  %s19_s17 = int_to_ptr.hbm [resolvable:$true] %s18_s17  ;;  %s21_s19 = int_to_ptr.vmem [resolvable:$true] %s20_s19 }
   0x2   :  { %s220_s21 = smov 4  }
   0x3   :  { %26 = dma.hbm_to_vmem [thread:$0]  %s19_s17, 1024, %s21_s19, [#allocation3], %s219_s20, %s219_s20, %s220_s21  }
   0x4   :  { %216 = dma.done.wait [#allocation3], 1024  }
   0x5   :  { %217 = vsyncadd [#allocation3], 4294966272  ;;  %vm40_vm0 = vcmask 1043456   ;;  %v35_v0 = vld [vmem:[%s262_s1] sm:$0xf]  ;;  %v187_v1 = vld [vmem:[#allocation2 + $0x38] sm:$0xff] }
   0x6   :  { %v42_v2 = vsel %vm40_vm0, %v35_v0, 0  ;;  %v34_v3 = vld [vmem:[%s261_s0] sm:$0xf]  ;;  %vm36_vm1 = vcmask 64512   ;;  %127 = vmatpush.bf16.msra.mxu1 %v187_v1  ;;  %v186_v4 = vld [vmem:[#allocation2 + $0x30] sm:$0xff]  ;;  %v185_v5 = vld [vmem:[#allocation2 + $0x28] sm:$0xff] }
   0x7   :  { %51 = vmatpush.bf16.msra.mxu0 %v42_v2  ;;  %v184_v6 = vld [vmem:[#allocation2 + $0x20] sm:$0xff]  ;;  %v183_v7 = vld [vmem:[#allocation2 + $0x18] sm:$0xff]  ;;  %v182_v8 = vld [vmem:[#allocation2 + $0x10] sm:$0xff] }
   0x8   :  { %v181_v9 = vld [vmem:[#allocation2 + $0x8] sm:$0xff]  ;;  %v180_v10 = vld [vmem:[#allocation2] sm:$0xff] }
   0x9   :  { %v191_v15 = vld [vmem:[%s264_s3] ss:$0 sm:$0xff] }
   0xa   :  { %147 = vmatmul.msk.bf16.vlgmr.msra.gmra.mxu0 %vm36_vm1, %v34_v3  ;;  %128 = vmatpush.bf16.msra.mxu1 %v186_v4 }
   0xe   :  { %129 = vmatpush.bf16.msra.mxu1 %v185_v5 }
  0x12   :  { %130 = vmatpush.bf16.msra.mxu1 %v184_v6 }
  0x16   :  { %131 = vmatpush.bf16.msra.mxu1 %v183_v7 }
  0x1a   :  { %132 = vmatpush.bf16.msra.mxu1 %v182_v8 }
  0x1e   :  { %133 = vmatpush.bf16.msra.mxu1 %v181_v9 }
  0x22   :  { %134 = vmatpush.bf16.msra.mxu1 %v180_v10 }
  0x87   :  { %v53_v11 = vpop.f32.mrf.mxu0 }
  0x88   :  { %v57_v12 = vmax.f32 %v53_v11, 0.0 }
  0x8a   :  { %v58_v13 = vpack.c.bf16 %v57_v12, %v57_v12 }
  0x8c   :  { %135 = vmatmul.bf16.vlgmr.msra.gmra.mxu1 %v58_v13 }
  0x8f   :  { %v55_v14 = vpop.f32.mrf.mxu0 }
 0x109   :  { %v136_v16 = vpop.f32.mrf.mxu1 }
 0x10a   :  { %v137_v17 = vadd.f32 %v191_v15, %v136_v16 }
 0x10c   :  { %v140_v18 = vpack.c.bf16 %v137_v17, %v137_v17 }
 0x10e   :  { %141 = vst [vmem:[%s265_s4] sm:$0xf] %v140_v18 }
 0x111   :  { %v138_v19 = vpop.f32.mrf.mxu1 }
 0x112   :  { %146 = vsyncpa [#allocation3], 1 }

</bundles_post_ra>
